<compile_context>
chip_gen: v7x
topology: tpu7x:2x2x1
jax: 0.10.0
libtpu: 0.0.40
codegen_flags: <defaults>
</compile_context>

<pallas_src>
import functools

import jax
import jax.numpy as jnp
from jax.experimental import pallas as pl
from jax.experimental.pallas import tpu as pltpu

_MIB = 1024 * 1024


# ----------------------------- kernels -----------------------------

def _fwln_rows_kernel(x_ref, gamma_ref, beta_ref, o_ref, *, eps):
    """Rows layout: block (tr, T); normalize each row over the lane (T) axis."""
    x = x_ref[...].astype(jnp.float32)                        # (tr, T)
    mean = jnp.mean(x, axis=-1, keepdims=True)                # (tr, 1)
    diff = x - mean
    var = jnp.mean(diff * diff, axis=-1, keepdims=True)       # biased (unbiased=False)
    std = jnp.sqrt(var)
    # PyTorch semantics: (x - mean) / (std + eps). Exact reciprocal on a tiny vector.
    inv = pl.reciprocal(std + eps, approx=False)               # (tr, 1)
    scale = gamma_ref[...] * inv                               # (tr, 1)
    shift = beta_ref[...] - mean * scale                       # (tr, 1)
    o_ref[...] = (x * scale + shift).astype(o_ref.dtype)       # 2 VPU ops / elem


def _fwln_tdim1_kernel(x_ref, gamma_ref, beta_ref, o_ref, *, eps):
    """[B, T, C] layout: block (1, T, tc); normalize over T (the sublane axis)."""
    x = x_ref[0].astype(jnp.float32)                           # (T, tc)
    mean = jnp.mean(x, axis=0, keepdims=True)                  # (1, tc)
    diff = x - mean
    var = jnp.mean(diff * diff, axis=0, keepdims=True)
    std = jnp.sqrt(var)
    inv = pl.reciprocal(std + eps, approx=False)               # (1, tc)
    scale = gamma_ref[...] * inv                               # (1, tc)
    shift = beta_ref[...] - mean * scale
    o_ref[0] = (x * scale + shift).astype(o_ref.dtype)


# --------------------------- tile sizing ----------------------------

def _vmem_capacity_bytes():
    try:
        cap = int(getattr(pltpu.get_tpu_info(), "vmem_capacity_bytes", 0))
        if cap > 0:
            return cap
    except Exception:
        pass
    return 64 * _MIB  # conservative default (v7x per-core VMEM)


def _budgets():
    cap = _vmem_capacity_bytes()
    vmem_limit = (cap * 3) // 4                 # raised scoped limit, keep headroom
    # Per grid step ~6 block-sized f32 slabs are live (2x in + 2x out double
    # buffers + f32 temps). Cap blocks at 8 MiB; v7x (48 MiB budget) -> 6 MiB.
    target_block = min(8 * _MIB, max(1 * _MIB, vmem_limit // 8))
    return target_block, vmem_limit


def _row_tile(n_rows, row_bytes, target_bytes):
    rows = max(1, target_bytes // max(row_bytes, 1))
    if rows >= n_rows:
        return n_rows                            # full dim always legal
    rows = max(8, (rows // 8) * 8)               # < full dim: multiple of 8
    return min(rows, n_rows)


def _lane_tile(n_lanes, col_bytes, target_bytes):
    lanes = max(1, target_bytes // max(col_bytes, 1))
    if lanes >= n_lanes:
        return n_lanes                           # full dim always legal
    lanes = max(128, (lanes // 128) * 128)       # < full dim: multiple of 128
    return min(lanes, n_lanes)


# ----------------------------- wrapper ------------------------------

def feature_wise_layer_norm(x, gamma, beta, *, eps=1e-5, time_dim=2):
    """Feature-wise LayerNorm.

    x: [B, C, T] if time_dim == 2, [B, T, C] if time_dim == 1.
    gamma/beta: [C]. Returns array of same shape/dtype as x.
    """
    if time_dim not in (1, 2):
        raise ValueError(f"time_dim must be 1 or 2, got {time_dim}")

    out_dtype = x.dtype
    target_block, vmem_limit = _budgets()
    f32_size = 4  # stats/compute run in f32 regardless of input dtype

    if time_dim == 1:
        B, T, C = x.shape
        min_tc = C if C <= 128 else 128
        if T * min_tc * f32_size * 6 <= vmem_limit:
            # Native [B, T, C] path: C on lanes, full T per block, no transpose.
            tc = _lane_tile(C, T * f32_size, target_block)
            gamma2 = jnp.asarray(gamma, jnp.float32).reshape(1, C)
            beta2 = jnp.asarray(beta, jnp.float32).reshape(1, C)
            grid = (B, pl.cdiv(C, tc))
            kernel = functools.partial(_fwln_tdim1_kernel, eps=float(eps))
            return pl.pallas_call(
                kernel,
                out_shape=jax.ShapeDtypeStruct((B, T, C), out_dtype),
                grid_spec=pltpu.PrefetchScalarGridSpec(
                    num_scalar_prefetch=0,
                    grid=grid,
                    in_specs=[
                        pl.BlockSpec((1, T, tc), lambda b, c: (b, 0, c)),
                        pl.BlockSpec((1, tc), lambda b, c: (0, c)),
                        pl.BlockSpec((1, tc), lambda b, c: (0, c)),
                    ],
                    out_specs=pl.BlockSpec((1, T, tc), lambda b, c: (b, 0, c)),
                ),
                compiler_params=pltpu.CompilerParams(
                    dimension_semantics=("parallel", "parallel"),
                    vmem_limit_bytes=vmem_limit,
                ),
            )(x, gamma2, beta2)
        # TODO(synk): very long T with time_dim=1 -> tiled running-stats variant;
        # until then pay the transpose (extra HBM read+write each way).
        xt = jnp.swapaxes(x, 1, 2)
        out = feature_wise_layer_norm(xt, gamma, beta, eps=eps, time_dim=2)
        return jnp.swapaxes(out, 1, 2)

    # time_dim == 2: [B, C, T]. Flatten to rows: long 1-D grid, no padding,
    # blocks sized purely by the VMEM budget, evenly shardable on v7x megacore.
    B, C, T = x.shape
    R = B * C
    xr = x.reshape(R, T)                                        # free contiguous reshape
    gamma_r = jnp.broadcast_to(
        jnp.asarray(gamma, jnp.float32).reshape(1, C), (B, C)).reshape(R, 1)
    beta_r = jnp.broadcast_to(
        jnp.asarray(beta, jnp.float32).reshape(1, C), (B, C)).reshape(R, 1)

    tr = _row_tile(R, T * f32_size, target_block)
    grid = (pl.cdiv(R, tr),)
    kernel = functools.partial(_fwln_rows_kernel, eps=float(eps))

    out = pl.pallas_call(
        kernel,
        out_shape=jax.ShapeDtypeStruct((R, T), out_dtype),
        grid_spec=pltpu.PrefetchScalarGridSpec(
            num_scalar_prefetch=0,
            grid=grid,
            in_specs=[
                pl.BlockSpec((tr, T), lambda i: (i, 0)),
                pl.BlockSpec((tr, 1), lambda i: (i, 0)),
                pl.BlockSpec((tr, 1), lambda i: (i, 0)),
            ],
            out_specs=pl.BlockSpec((tr, T), lambda i: (i, 0)),
        ),
        compiler_params=pltpu.CompilerParams(
            dimension_semantics=("parallel",),
            vmem_limit_bytes=vmem_limit,
        ),
    )(xr, gamma_r, beta_r)

    return out.reshape(B, C, T)


# ------------------------------ test --------------------------------

if __name__ == "__main__":
    B, C, T = 2, 8, 128
    eps = 1e-5

    x = jax.random.normal(jax.random.PRNGKey(0), (B, C, T), dtype=jnp.float32)
    # Deterministic parameter init matching nn.Module.__init__ (gamma=1, beta=0).
    gamma = jnp.ones((C,), dtype=jnp.float32)
    beta = jnp.zeros((C,), dtype=jnp.float32)

    def ref_fwln(x, gamma, beta, eps, time_dim):
        mean = jnp.mean(x, axis=time_dim, keepdims=True)
        std = jnp.sqrt(jnp.mean((x - mean) ** 2, axis=time_dim, keepdims=True))
        xn = (x - mean) / (std + eps)
        shape = (1, -1, 1) if time_dim == 2 else (1, 1, -1)
        return gamma.reshape(shape) * xn + beta.reshape(shape)

    out = jax.block_until_ready(feature_wise_layer_norm(x, gamma, beta, eps=eps))
    assert out.shape == (B, C, T) and out.dtype == x.dtype
    assert jnp.allclose(out, ref_fwln(x, gamma, beta, eps, 2), atol=1e-5, rtol=1e-5)

    # Non-128-multiple T (exercises the unpadded masked-tail-store path).
    T2 = 100
    x2 = jax.random.normal(jax.random.PRNGKey(1), (B, C, T2), dtype=jnp.float32)
    out2 = jax.block_until_ready(feature_wise_layer_norm(x2, gamma, beta, eps=eps))
    assert jnp.allclose(out2, ref_fwln(x2, gamma, beta, eps, 2), atol=1e-5, rtol=1e-5)

    # Native time_dim=1 path ([B, T, C], normalize over dim 1, no transpose).
    x3 = jnp.swapaxes(x, 1, 2)
    out3 = jax.block_until_ready(
        feature_wise_layer_norm(x3, gamma, beta, eps=eps, time_dim=1))
    assert jnp.allclose(out3, ref_fwln(x3, gamma, beta, eps, 1), atol=1e-5, rtol=1e-5)

    # Non-trivial affine params (exercises the folded scale/shift).
    gamma_aff = jax.random.normal(jax.random.PRNGKey(2), (C,), dtype=jnp.float32)
    beta_aff = jax.random.normal(jax.random.PRNGKey(3), (C,), dtype=jnp.float32)
    out4 = jax.block_until_ready(
        feature_wise_layer_norm(x, gamma_aff, beta_aff, eps=eps))
    assert jnp.allclose(out4, ref_fwln(x, gamma_aff, beta_aff, eps, 2),
                        atol=1e-5, rtol=1e-5)

    print("KERNEL_OK")
</pallas_src>

<mosaic_0001>
module attributes {stable_mosaic.version = 11 : i64} {
  func.func @_fwln_rows_kernel(%arg0: i32, %arg1: memref<16x128xf32, #tpu.memory_space<vmem>>, %arg2: memref<16x1xf32, #tpu.memory_space<vmem>>, %arg3: memref<16x1xf32, #tpu.memory_space<vmem>>, %arg4: memref<16x128xf32, #tpu.memory_space<vmem>>) attributes {dimension_semantics = [#tpu.dimension_semantics<parallel>], iteration_bounds = array<i64: 1>, scalar_prefetch = 0 : i64, scratch_operands = 0 : i64, tpu.core_type = #tpu.core_type<tc>, window_params = [{transform_indices = @transform_0, window_bounds = array<i64: 16, 128>}, {transform_indices = @transform_1, window_bounds = array<i64: 16, 1>}, {transform_indices = @transform_2, window_bounds = array<i64: 16, 1>}, {transform_indices = @transform_3, window_bounds = array<i64: 16, 128>}]} {
    %c0 = arith.constant 0 : index
    %c0_0 = arith.constant 0 : index
    %0 = vector.load %arg1[%c0, %c0_0] : memref<16x128xf32, #tpu.memory_space<vmem>>, vector<16x128xf32>
    %cst = arith.constant dense<0.000000e+00> : vector<16xf32>
    %1 = vector.multi_reduction <add>, %0, %cst [1] : vector<16x128xf32> to vector<16xf32>
    %2 = vector.shape_cast %1 : vector<16xf32> to vector<16x1xf32>
    %cst_1 = arith.constant 1.280000e+02 : f32
    %3 = vector.broadcast %cst_1 : f32 to vector<16x1xf32>
    %4 = arith.divf %2, %3 : vector<16x1xf32>
    %5 = vector.broadcast %4 : vector<16x1xf32> to vector<16x128xf32>
    %6 = arith.subf %0, %5 : vector<16x128xf32>
    %7 = arith.mulf %6, %6 : vector<16x128xf32>
    %cst_2 = arith.constant dense<0.000000e+00> : vector<16xf32>
    %8 = vector.multi_reduction <add>, %7, %cst_2 [1] : vector<16x128xf32> to vector<16xf32>
    %9 = vector.shape_cast %8 : vector<16xf32> to vector<16x1xf32>
    %cst_3 = arith.constant 1.280000e+02 : f32
    %10 = vector.broadcast %cst_3 : f32 to vector<16x1xf32>
    %11 = arith.divf %9, %10 : vector<16x1xf32>
    %12 = math.sqrt %11 : vector<16x1xf32>
    %cst_4 = arith.constant 9.99999974E-6 : f32
    %13 = vector.broadcast %cst_4 : f32 to vector<16x1xf32>
    %14 = arith.addf %12, %13 : vector<16x1xf32>
    %15 = tpu.reciprocal %14 : vector<16x1xf32> -> vector<16x1xf32>
    %c0_5 = arith.constant 0 : index
    %c0_6 = arith.constant 0 : index
    %16 = vector.load %arg2[%c0_5, %c0_6] : memref<16x1xf32, #tpu.memory_space<vmem>>, vector<16x1xf32>
    %17 = arith.mulf %16, %15 : vector<16x1xf32>
    %c0_7 = arith.constant 0 : index
    %c0_8 = arith.constant 0 : index
    %18 = vector.load %arg3[%c0_7, %c0_8] : memref<16x1xf32, #tpu.memory_space<vmem>>, vector<16x1xf32>
    %19 = arith.mulf %4, %17 : vector<16x1xf32>
    %20 = arith.subf %18, %19 : vector<16x1xf32>
    %21 = vector.broadcast %17 : vector<16x1xf32> to vector<16x128xf32>
    %22 = arith.mulf %0, %21 : vector<16x128xf32>
    %23 = vector.broadcast %20 : vector<16x1xf32> to vector<16x128xf32>
    %24 = arith.addf %22, %23 : vector<16x128xf32>
    %c0_9 = arith.constant 0 : index
    %c0_10 = arith.constant 0 : index
    %25 = vector.load %arg4[%c0_9, %c0_10] : memref<16x128xf32, #tpu.memory_space<vmem>>, vector<16x128xf32>
    tpu.vector_store %arg4[%c0_9, %c0_10], %24 {strides = array<i32>} : memref<16x128xf32, #tpu.memory_space<vmem>>, vector<16x128xf32>,
    return
  }
  func.func @transform_0(%arg0: i32) -> (i32, i32) {
    %c0_i32 = arith.constant 0 : i32
    %c0_i32_0 = arith.constant 0 : i32
    return %arg0, %c0_i32 : i32, i32
  }
  func.func @transform_1(%arg0: i32) -> (i32, i32) {
    %c0_i32 = arith.constant 0 : i32
    %c0_i32_0 = arith.constant 0 : i32
    return %arg0, %c0_i32 : i32, i32
  }
  func.func @transform_2(%arg0: i32) -> (i32, i32) {
    %c0_i32 = arith.constant 0 : i32
    %c0_i32_0 = arith.constant 0 : i32
    return %arg0, %c0_i32 : i32, i32
  }
  func.func @transform_3(%arg0: i32) -> (i32, i32) {
    %c0_i32 = arith.constant 0 : i32
    %c0_i32_0 = arith.constant 0 : i32
    return %arg0, %c0_i32 : i32, i32
  }
}

</mosaic_0001>

<bundles_post_ra>
// kernel: tpu_custom_call.1
= control target key start
LH: loop header
LB: loop body
LE: loop exit
PB: predicated region body
PF: predicated region fallthrough
CT: control target
= control target key end

     0   :  { %s196_s0 = inlined_call_operand.vmem [shape: f32[16,128], index: 0, kind: input, shape index: {}]   ;;  %s197_s1 = inlined_call_operand.vmem [shape: f32[16,1], index: 1, kind: input, shape index: {}]   ;;  %s198_s2 = inlined_call_operand.vmem [shape: f32[16,1], index: 2, kind: input, shape index: {}]   ;;  %s199_s3 = inlined_call_operand.hbm [shape: f32[16,128], index: 3, kind: output, shape index: {}]  }
   0x1   :  { %v15_v0 = vld [vmem:[%s196_s0] sm:$0xff] }
   0x2   :  { %8 = vsyncpa [#allocation3], 0  ;;  %17 = vadd.xlane.f32.xlu0 %v15_v0  ;;  %v16_v1 = vld [vmem:[%s196_s0 + $0x8] sm:$0xff]  ;;  %v142_v10 = vmov 0   ;;  %v52_v27 = vld [vmem:[%s197_s1] sm:$0xff] }
   0x3   :  { %108 = vset.pattern.permute.xlu0 %v142_v10  ;;  %109 = vset.pattern.permute.xlu1 %v142_v10  ;;  %v53_v30 = vld [vmem:[%s197_s1 + $0x8] sm:$0xff]  ;;  %v56_v34 = vld [vmem:[%s198_s2] sm:$0xff]  ;;  %s143_s1 = smov [#allocation2]  }
   0x4   :  { %v57_v37 = vld [vmem:[%s198_s2 + $0x8] sm:$0xff]  ;;  %s93_s23 = sshll.u32 %s143_s1, 4  ;;  %s94_s23 = int_to_ptr.vmem [resolvable:$true] %s93_s23 }
   0x5   :  { %s118_s24 = scalar_lea.vmem %s94_s23, 256  ;;  %p123_p1 = scmp.lt.s32.totalorder %s94_s23, %s94_s23 }
   0x6   :  { %19 = vadd.xlane.f32.xlu0 %v16_v1  ;;  %p119_p0 = scmp.ne.s32.totalorder %s94_s23, %s118_s24  ;;  %p124_p2 = scmp.lt.s32.totalorder %s118_s24, %s118_s24 }
   0x8   :  { %p125_p3 = por %p124_p2, %p123_p1 }
   0xa   :  { %p126_p4 = pnand %p125_p3, %p119_p0 }
  0x8f   :  { %v18_v2 = vpop.xlane.xlu0 %17 }
  0x90   :  { %v22_v3 = vmul.f32 0.0078125, %v18_v2 }
  0x92   :  { %v24_v4 = vsub.f32 %v15_v0, %v22_v3 }
  0x93   :  { %v20_v5 = vpop.xlane.xlu0 %19 }
  0x94   :  { %v23_v6 = vmul.f32 0.0078125, %v20_v5  ;;  %v26_v7 = vmul.f32 %v24_v4, %v24_v4 }
  0x96   :  { %28 = vadd.xlane.f32.xlu1 %v26_v7  ;;  %v25_v8 = vsub.f32 %v16_v1, %v23_v6 }
  0x98   :  { %v27_v9 = vmul.f32 %v25_v8, %v25_v8 }
  0x9a   :  { %30 = vadd.xlane.f32.xlu1 %v27_v9 }
 0x123   :  { %v29_v11 = vpop.xlane.xlu1 %28 }
 0x124   :  { %v32_v12 = vmul.f32 0.0078125, %v29_v11 }
 0x126   :  { %110 = vrsqrt.f32 %v32_v12  ;;  %vm36_vm0 = vcmp.eq.f32.partialorder %v32_v12, inf  ;;  %v39_v17 = vand.u32 2147483648, %v32_v12  ;;  %vm38_vm1 = vcmp.eq.f32.partialorder %v32_v12, 0.0 }
 0x127   :  { %v31_v13 = vpop.xlane.xlu1 %30 }
 0x128   :  { %v33_v14 = vmul.f32 0.0078125, %v31_v13 }
 0x12a   :  { %112 = vrsqrt.f32 %v33_v14  ;;  %vm43_vm2 = vcmp.eq.f32.partialorder %v33_v14, inf  ;;  %v46_v23 = vand.u32 2147483648, %v33_v14  ;;  %vm45_vm3 = vcmp.eq.f32.partialorder %v33_v14, 0.0 }
 0x130   :  { %v111_v15 = vpop.eup %110 }
 0x131   :  { %v35_v16 = vmul.f32 %v111_v15, %v32_v12 }
 0x133   :  { %v37_v18 = vsel %vm36_vm0, %v32_v12, %v35_v16 }
 0x134   :  { %v113_v19 = vpop.eup %112  ;;  %v40_v20 = vsel %vm38_vm1, %v39_v17, %v37_v18 }
 0x135   :  { %v42_v21 = vmul.f32 %v113_v19, %v33_v14  ;;  %v48_v22 = vadd.f32 1e-05, %v40_v20 }
 0x137   :  { %114 = vrcp.f32 %v48_v22  ;;  %v44_v24 = vsel %vm43_vm2, %v33_v14, %v42_v21 }
 0x138   :  { %v47_v25 = vsel %vm45_vm3, %v46_v23, %v44_v24 }
 0x139   :  { %v49_v26 = vadd.f32 1e-05, %v47_v25 }
 0x13b   :  { %116 = vrcp.f32 %v49_v26 }
 0x141   :  { %v115_v28 = vpop.eup %114 }
 0x142   :  { %v54_v29 = vmul.f32 %v115_v28, %v52_v27 }
 0x144   :  { %64 = vperm.xlu0 %108, %v54_v29   ;;  %v58_v33 = vmul.f32 %v54_v29, %v22_v3 }
 0x145   :  { %v117_v31 = vpop.eup %116 }
 0x146   :  { %v55_v32 = vmul.f32 %v117_v31, %v53_v30  ;;  %v60_v35 = vsub.f32 %v56_v34, %v58_v33 }
 0x148   :  { %69 = vperm.xlu1 %109, %v55_v32   ;;  %v59_v36 = vmul.f32 %v55_v32, %v23_v6 }
 0x14a   :  { %v61_v38 = vsub.f32 %v57_v37, %v59_v36 }
 0x14c   :  { %76 = vperm.xlu1 %109, %v60_v35  }
 0x150   :  { %81 = vperm.xlu1 %109, %v61_v38  }
 0x1c3   :  { %v65_v39 = vpop.permute.xlu0 %64 }
 0x1c4   :  { %v72_v41 = vmul.f32 %v65_v39, %v15_v0 }
 0x1c7   :  { %v70_v40 = vpop.permute.xlu1 %69 }
 0x1c8   :  { %v73_v44 = vmul.f32 %v70_v40, %v16_v1 }
 0x1cb   :  { %v77_v42 = vpop.permute.xlu1 %76 }
 0x1cc   :  { %v84_v43 = vadd.f32 %v77_v42, %v72_v41 }
 0x1ce   :  { %86 = vst [vmem:[#allocation2] sm:$0xff] %v84_v43 }
 0x1cf   :  { %v82_v45 = vpop.permute.xlu1 %81 }
 0x1d0   :  { %v85_v46 = vadd.f32 %v82_v45, %v73_v44 }
 0x1d2   :  { %87 = vst [vmem:[#allocation2 + $0x8] sm:$0xff] %v85_v46 }
 0x1d3   :  { %129 = shalt.err (!%p126_p4)
}
 0x1d4   :  { %s130_s26 = scalar_lea.hbm %s199_s3, 256 }
 0x1d5   :  { %p131_p5 = scmp.ne.s32.totalorder %s199_s3, %s130_s26  ;;  %p134_p6 = scmp.lt.u32.totalorder %s130_s26, %s199_s3 }
 0x1d7   :  { %p136_p7 = pnand %p134_p6, %p131_p5 }
 0x1d9   :  { %139 = shalt.err (!%p136_p7)
}
 0x1da   :  { %s144_s4 = smov 128   ;;  %s145_s5 = smov 8  }
 0x1db   :  { %99 = dma.vmem_to_hbm [thread:$0]  %s94_s23, 256, %s199_s3, [#allocation3], %s144_s4, %s144_s4, %s145_s5  }
 0x1dc   :  { %140 = dma.done.wait [#allocation3], 256  }
 0x1dd   :  { %141 = vsyncadd [#allocation3], 4294967040 }
 0x1de   :  { %103 = vsyncpa [#allocation3], 1 }

</bundles_post_ra>
